<compile_context>
chip_gen: v6e
topology: v6e:2x2x1
jax: 0.10.0
libtpu: 0.0.40
codegen_flags: <defaults>
</compile_context>

<pallas_src>
import functools

import numpy as np

import jax
import jax.numpy as jnp
from jax.experimental import pallas as pl
from jax.experimental.pallas import tpu as pltpu


# ----------------------------------------------------------------------------
# Helpers
# ----------------------------------------------------------------------------

def _round_up(v: int, m: int) -> int:
    return ((v + m - 1) // m) * m


def _pick_tile(dim: int, cap: int, align: int) -> int:
    """Largest tile (multiple of `align`, <= cap) that divides `dim` if any;
    for dims <= cap use a single (possibly slightly padded) tile."""
    cap = max(align, (cap // align) * align)
    if dim <= cap:
        return _round_up(dim, align)
    for t in range(cap, align - 1, -align):
        if dim % t == 0:
            return t
    return cap


def _vmem_capacity_bytes() -> int:
    """Per-TensorCore VMEM capacity; conservative (v7x) fallback."""
    try:
        info = pltpu.get_tpu_info()
        return int(getattr(info, "vmem_capacity_bytes", 64 << 20))
    except Exception:
        return 64 << 20


# ----------------------------------------------------------------------------
# Kernels
# ----------------------------------------------------------------------------

def _linear_small_kernel(x_ref, w_ref, b_ref, o_ref):
    """Single-block y = x @ W + b (exact f32), for small problems."""
    o_ref[...] = (
        jnp.dot(x_ref[...], w_ref[...], preferred_element_type=jnp.float32)
        + b_ref[...]
    ).astype(o_ref.dtype)


def _linear_tile_kernel_f32out(x_ref, w_ref, b_ref, o_ref):
    """One (tm, tn) output tile accumulated over the K grid axis.

    The output block index (i, j) is K-invariant, so the f32 output block
    stays resident in VMEM across K; accumulate directly into it (no scratch)
    and fold the bias into the K==0 init (no finalize branch needed).
    """
    @pl.when(pl.program_id(2) == 0)
    def _init():
        o_ref[...] = jnp.broadcast_to(b_ref[...], o_ref.shape)

    o_ref[...] += jnp.dot(
        x_ref[...], w_ref[...], preferred_element_type=jnp.float32
    )


def _linear_tile_kernel_scratch(x_ref, w_ref, b_ref, o_ref, acc_ref):
    """Variant with an f32 VMEM accumulator for non-f32 output dtypes."""
    k = pl.program_id(2)

    @pl.when(k == 0)
    def _init():
        acc_ref[...] = jnp.broadcast_to(b_ref[...], acc_ref.shape)

    acc_ref[...] += jnp.dot(
        x_ref[...], w_ref[...], preferred_element_type=jnp.float32
    )

    @pl.when(k == pl.num_programs(2) - 1)
    def _finalize():
        o_ref[...] = acc_ref[...].astype(o_ref.dtype)


# ----------------------------------------------------------------------------
# Pallas wrappers
# ----------------------------------------------------------------------------

@jax.jit
def _linear_small(x2d, weight, bias):
    """Single-block path for small shapes (skips the 3-D grid entirely)."""
    m, k = x2d.shape
    n = weight.shape[1]
    # Minimal alignment pad (sublane 8 / lane 128); trivial at these sizes.
    m_p, k_p, n_p = _round_up(m, 8), _round_up(k, 128), _round_up(n, 128)

    x_p = x2d if (m_p, k_p) == (m, k) else jnp.pad(
        x2d, ((0, m_p - m), (0, k_p - k)))
    w_p = weight if (k_p, n_p) == (k, n) else jnp.pad(
        weight, ((0, k_p - k), (0, n_p - n)))
    b_p = bias.astype(jnp.float32).reshape(1, n)
    if n_p != n:
        b_p = jnp.pad(b_p, ((0, 0), (0, n_p - n)))

    out = pl.pallas_call(
        _linear_small_kernel,
        out_shape=jax.ShapeDtypeStruct((m_p, n_p), x2d.dtype),
    )(x_p, w_p, b_p)
    return out[:m, :n]


@functools.partial(
    jax.jit,
    static_argnames=("tm", "tn", "tk", "operand_dtype", "vmem_limit"))
def _linear_tiled(x2d, weight, bias, *, tm, tn, tk, operand_dtype, vmem_limit):
    m, k = x2d.shape
    n = weight.shape[1]
    out_dtype = x2d.dtype
    op_dtype = np.dtype(operand_dtype)

    m_p, k_p, n_p = _round_up(m, tm), _round_up(k, tk), _round_up(n, tn)

    # Operand cast (bf16 by default) keeps the f32 accumulator exact-ish while
    # halving DMA bytes and hitting the bf16-native MXU path.
    x_o = x2d.astype(op_dtype)
    w_o = weight.astype(op_dtype)
    # Pad only when dims are not already tile multiples (common transformer
    # dims need no padding at all -> no extra HBM pass).
    if (m_p, k_p) != (m, k):
        x_o = jnp.pad(x_o, ((0, m_p - m), (0, k_p - k)))
    if (k_p, n_p) != (k, n):
        w_o = jnp.pad(w_o, ((0, k_p - k), (0, n_p - n)))
    b_p = bias.astype(jnp.float32).reshape(1, n)
    if n_p != n:
        b_p = jnp.pad(b_p, ((0, 0), (0, n_p - n)))

    grid = (m_p // tm, n_p // tn, k_p // tk)

    op_bytes = op_dtype.itemsize
    out_bytes = np.dtype(out_dtype).itemsize
    # Realistic HBM traffic: x is re-streamed once per N tile, W once per
    # M tile under this (i, j, k) schedule.
    cost = pl.CostEstimate(
        flops=2 * m_p * k_p * n_p,
        transcendentals=0,
        bytes_accessed=(
            m_p * k_p * op_bytes * grid[1]
            + k_p * n_p * op_bytes * grid[0]
            + n_p * 4 * grid[0]
            + m_p * n_p * out_bytes
        ),
    )

    in_specs = [
        pl.BlockSpec((tm, tk), lambda i, j, kk: (i, kk)),   # x tile
        pl.BlockSpec((tk, tn), lambda i, j, kk: (kk, j)),   # W tile
        pl.BlockSpec((1, tn), lambda i, j, kk: (0, j)),     # bias slice
    ]
    out_spec = pl.BlockSpec((tm, tn), lambda i, j, kk: (i, j))

    if np.dtype(out_dtype) == np.dtype(jnp.float32):
        kernel = _linear_tile_kernel_f32out
        scratch = []                                        # accumulate in o_ref
    else:
        kernel = _linear_tile_kernel_scratch
        scratch = [pltpu.VMEM((tm, tn), jnp.float32)]

    out = pl.pallas_call(
        kernel,
        out_shape=jax.ShapeDtypeStruct((m_p, n_p), out_dtype),
        grid_spec=pltpu.PrefetchScalarGridSpec(
            num_scalar_prefetch=0,
            grid=grid,
            in_specs=in_specs,
            out_specs=out_spec,
            scratch_shapes=scratch,
        ),
        compiler_params=pltpu.CompilerParams(
            dimension_semantics=("parallel", "parallel", "arbitrary"),
            vmem_limit_bytes=vmem_limit,
        ),
        cost_estimate=cost,
    )(x_o, w_o, b_p)

    return out[:m, :n]


# ----------------------------------------------------------------------------
# Forward of _RFModuleAsPTModule(rf.Linear)
# ----------------------------------------------------------------------------

def rf_linear_as_pt_forward(x, weight, bias, *, operand_dtype=jnp.bfloat16):
    """Forward of _RFModuleAsPTModule wrapping rf.Linear: y = x @ W + b.

    x:      [batch, seq, in_dim]   float32
    weight: [in_dim, out_dim]      float32
    bias:   [out_dim]              float32
    returns [batch, seq, out_dim]  in x.dtype
    """
    batch, seq, in_dim = x.shape
    out_dim = weight.shape[1]
    m = batch * seq
    x2d = x.reshape(m, in_dim)

    # Small-problem fallback: one exact-f32 block, no 3-D grid / per-step
    # overhead, no large K padding blow-up.
    small = (
        m < 128 or in_dim < 128 or out_dim < 128
        or (m * in_dim + in_dim * out_dim + m * out_dim) * 4 <= (1 << 20)
    )
    if small:
        return _linear_small(x2d, weight, bias).reshape(batch, seq, out_dim)

    # Generation-aware tile ceilings.
    vmem_cap = _vmem_capacity_bytes()
    if vmem_cap >= (100 << 20):          # v5e / v6e: 128 MiB VMEM per TC
        tm_cap, tn_cap, tk_cap = 1024, 1024, 1024
    else:                                # v7x: 64 MiB VMEM per TC
        tm_cap, tn_cap, tk_cap = 1024, 512, 1024

    tm = _pick_tile(m, tm_cap, 128)
    tn = _pick_tile(out_dim, tn_cap, 128)
    tk = _pick_tile(in_dim, tk_cap, 128)

    # Ensure at least 2 MxN output tiles so both TensorCores get work on
    # dual-TC (v7x) chips; harmless no-op elsewhere.
    m_p, n_p = _round_up(m, tm), _round_up(out_dim, tn)
    if (m_p // tm) * (n_p // tn) < 2:
        if n_p >= 256 and (n_p // 2) % 128 == 0:
            tn = n_p // 2
        elif m_p >= 256 and (m_p // 2) % 128 == 0:
            tm = m_p // 2

    # Explicit VMEM limit sized from the double-buffered footprint.
    op_dtype = np.dtype(operand_dtype)
    op_b = op_dtype.itemsize
    out_b = np.dtype(x.dtype).itemsize
    footprint = 2 * (tm * tk + tk * tn) * op_b + 2 * tm * tn * out_b + 2 * tn * 4
    if np.dtype(x.dtype) != np.dtype(jnp.float32):
        footprint += tm * tn * 4         # f32 accumulator scratch
    vmem_limit = int(min(
        max(32 << 20, 2 * footprint + (8 << 20)),
        max(32 << 20, vmem_cap - (16 << 20)),
    ))

    out2d = _linear_tiled(
        x2d, weight, bias,
        tm=tm, tn=tn, tk=tk,
        operand_dtype=op_dtype, vmem_limit=vmem_limit,
    )
    return out2d.reshape(batch, seq, out_dim)


# TODO(synk): `_RFModuleAsPTModule` also mirrors child modules and re-binds RF
# parameters in `_apply`; that is pure Python bookkeeping with no tensor
# compute and hence has no Pallas equivalent.


# ----------------------------------------------------------------------------
# Demo / self-check
# ----------------------------------------------------------------------------

if __name__ == "__main__":
    key = jax.random.PRNGKey(0)
    k_x, k_w, k_b, k_x2, k_w2, k_b2 = jax.random.split(key, 6)

    # --- Small shape (rf.Linear(32 -> 128), small-problem single-block path) ---
    batch, seq, in_dim, out_dim = 2, 8, 32, 128
    x = jax.random.normal(k_x, (batch, seq, in_dim), dtype=jnp.float32)
    weight = jax.random.normal(k_w, (in_dim, out_dim), dtype=jnp.float32) * 0.05
    bias = jax.random.normal(k_b, (out_dim,), dtype=jnp.float32) * 0.01

    y = jax.block_until_ready(rf_linear_as_pt_forward(x, weight, bias))
    y_ref = (x.reshape(-1, in_dim) @ weight + bias).reshape(batch, seq, out_dim)
    assert y.shape == (batch, seq, out_dim)
    assert jnp.allclose(y, y_ref, atol=2e-2, rtol=2e-2), "small path mismatch"

    # --- Larger shape exercising the tiled bf16-operand / f32-accumulate path ---
    batch2, seq2, in2, out2 = 4, 64, 256, 512
    x2 = jax.random.normal(k_x2, (batch2, seq2, in2), dtype=jnp.float32)
    w2 = jax.random.normal(k_w2, (in2, out2), dtype=jnp.float32) * 0.05
    b2 = jax.random.normal(k_b2, (out2,), dtype=jnp.float32) * 0.01

    y2 = jax.block_until_ready(rf_linear_as_pt_forward(x2, w2, b2))
    y2_ref = (x2.reshape(-1, in2) @ w2 + b2).reshape(batch2, seq2, out2)
    assert y2.shape == (batch2, seq2, out2)
    # bf16 operands (f32 accumulation) -> tolerance accordingly.
    assert jnp.allclose(y2, y2_ref, atol=5e-2, rtol=5e-2), "tiled path mismatch"

    print("KERNEL_OK")
</pallas_src>

<mosaic_0001>
module attributes {stable_mosaic.version = 11 : i64} {
  func.func @_linear_small_kernel(%arg0: memref<16x128xf32, #tpu.memory_space<vmem>>, %arg1: memref<128x128xf32, #tpu.memory_space<vmem>>, %arg2: memref<1x128xf32, #tpu.memory_space<vmem>>, %arg3: memref<16x128xf32, #tpu.memory_space<vmem>>) attributes {dimension_semantics = [], scalar_prefetch = 0 : i64, scratch_operands = 0 : i64, tpu.core_type = #tpu.core_type<tc>} {
    %c0 = arith.constant 0 : index
    %c0_0 = arith.constant 0 : index
    %0 = vector.load %arg0[%c0, %c0_0] : memref<16x128xf32, #tpu.memory_space<vmem>>, vector<16x128xf32>
    %c0_1 = arith.constant 0 : index
    %c0_2 = arith.constant 0 : index
    %1 = vector.load %arg1[%c0_1, %c0_2] : memref<128x128xf32, #tpu.memory_space<vmem>>, vector<128x128xf32>
    %cst = arith.constant dense<0.000000e+00> : vector<16x128xf32>
    %2 = tpu.matmul %0, %1, %cst {dimension_numbers = #tpu.dot_dimension_numbers<[1], [0], [0], [1], [0, 0, 1, 1], [], []>} : vector<16x128xf32>, vector<128x128xf32>, vector<16x128xf32> -> vector<16x128xf32>
    %c0_3 = arith.constant 0 : index
    %c0_4 = arith.constant 0 : index
    %3 = vector.load %arg2[%c0_3, %c0_4] : memref<1x128xf32, #tpu.memory_space<vmem>>, vector<1x128xf32>
    %4 = vector.broadcast %3 : vector<1x128xf32> to vector<16x128xf32>
    %5 = arith.addf %2, %4 : vector<16x128xf32>
    %c0_5 = arith.constant 0 : index
    %c0_6 = arith.constant 0 : index
    %6 = vector.load %arg3[%c0_5, %c0_6] : memref<16x128xf32, #tpu.memory_space<vmem>>, vector<16x128xf32>
    tpu.vector_store %arg3[%c0_5, %c0_6], %5 {strides = array<i32>} : memref<16x128xf32, #tpu.memory_space<vmem>>, vector<16x128xf32>,
    return
  }
}

</mosaic_0001>

<bundles_post_ra>
// kernel: _linear_small.1
= control target key start
LH: loop header
LB: loop body
LE: loop exit
PB: predicated region body
PF: predicated region fallthrough
CT: control target
= control target key end

     0   :  { %s295_s0 = inlined_call_operand.vmem [shape: f32[16,128], index: 0, kind: input, shape index: {}]   ;;  %s296_s1 = inlined_call_operand.vmem [shape: f32[128,128], index: 1, kind: input, shape index: {}]   ;;  %s297_s2 = inlined_call_operand.vmem [shape: f32[1,128], index: 2, kind: input, shape index: {}]   ;;  %s298_s3 = inlined_call_operand.hbm [shape: f32[16,128], index: 3, kind: output, shape index: {}]  }
   0x1   :  { %v32_v0 = vld [vmem:[%s296_s1 + $0x78] sm:$0xff]  ;;  %v31_v1 = vld [vmem:[%s296_s1 + $0x70] sm:$0xff]  ;;  %v30_v2 = vld [vmem:[%s296_s1 + $0x68] sm:$0xff] }
   0x2   :  { %152 = vmatprep.subr.mxu0 %v32_v0  ;;  %v29_v3 = vld [vmem:[%s296_s1 + $0x60] sm:$0xff]  ;;  %v28_v5 = vld [vmem:[%s296_s1 + $0x58] sm:$0xff] }
   0x3   :  { %153 = vmatpush3.msra.mxu0 %v32_v0  ;;  %v15_v4 = vld [vmem:[%s295_s0] sm:$0xff] }
   0x4   :  { %154 = vmatprep.subr.mxu0 %v31_v1  ;;  %184 = vmatprep.mubr.f32.mxu0 %v15_v4 }
   0x5   :  { %155 = vmatpush3.msra.mxu0 %v31_v1 }
   0x6   :  { %156 = vmatprep.subr.mxu0 %v30_v2 }
   0x7   :  { %157 = vmatpush3.msra.mxu0 %v30_v2 }
   0x8   :  { %8 = vsyncpa [#allocation3], 0  ;;  %158 = vmatprep.subr.mxu0 %v29_v3  ;;  %v27_v6 = vld [vmem:[%s296_s1 + $0x50] sm:$0xff]  ;;  %v26_v7 = vld [vmem:[%s296_s1 + $0x48] sm:$0xff]  ;;  %s212_s23 = smov [#allocation2]  }
   0x9   :  { %159 = vmatpush3.msra.mxu0 %v29_v3  ;;  %v25_v8 = vld [vmem:[%s296_s1 + $0x40] sm:$0xff]  ;;  %v24_v9 = vld [vmem:[%s296_s1 + $0x38] sm:$0xff]  ;;  %v23_v10 = vld [vmem:[%s296_s1 + $0x30] sm:$0xff]  ;;  %s122_s24 = sshll.u32 %s212_s23, 4  ;;  %s123_s24 = int_to_ptr.vmem [resolvable:$true] %s122_s24 }
   0xa   :  { %160 = vmatprep.subr.mxu0 %v28_v5  ;;  %v22_v11 = vld [vmem:[%s296_s1 + $0x28] sm:$0xff]  ;;  %v21_v12 = vld [vmem:[%s296_s1 + $0x20] sm:$0xff]  ;;  %v20_v13 = vld [vmem:[%s296_s1 + $0x18] sm:$0xff]  ;;  %p195_p1 = scmp.lt.s32.totalorder %s123_s24, %s123_s24 }
   0xb   :  { %161 = vmatpush3.msra.mxu0 %v28_v5  ;;  %v19_v14 = vld [vmem:[%s296_s1 + $0x10] sm:$0xff]  ;;  %v18_v15 = vld [vmem:[%s296_s1 + $0x8] sm:$0xff]  ;;  %v17_v16 = vld [vmem:[%s296_s1] sm:$0xff]  ;;  %s190_s1 = scalar_lea.vmem %s123_s24, 256 }
   0xc   :  { %162 = vmatprep.subr.mxu0 %v27_v6  ;;  %v16_v17 = vld [vmem:[%s295_s0 + $0x8] sm:$0xff]  ;;  %v133_v18 = vld [vmem:[%s297_s2] ss:$0 sm:$0xff]  ;;  %p191_p0 = scmp.ne.s32.totalorder %s123_s24, %s190_s1  ;;  %p196_p2 = scmp.lt.s32.totalorder %s190_s1, %s190_s1 }
   0xd   :  { %163 = vmatpush3.msra.mxu0 %v27_v6 }
   0xe   :  { %164 = vmatprep.subr.mxu0 %v26_v7  ;;  %p197_p3 = por %p196_p2, %p195_p1 }
   0xf   :  { %165 = vmatpush3.msra.mxu0 %v26_v7 }
  0x10   :  { %166 = vmatprep.subr.mxu0 %v25_v8  ;;  %p198_p4 = pnand %p197_p3, %p191_p0 }
  0x11   :  { %167 = vmatpush3.msra.mxu0 %v25_v8 }
  0x12   :  { %168 = vmatprep.subr.mxu0 %v24_v9 }
  0x13   :  { %169 = vmatpush3.msra.mxu0 %v24_v9 }
  0x14   :  { %170 = vmatprep.subr.mxu0 %v23_v10 }
  0x15   :  { %171 = vmatpush3.msra.mxu0 %v23_v10 }
  0x16   :  { %172 = vmatprep.subr.mxu0 %v22_v11 }
  0x17   :  { %173 = vmatpush3.msra.mxu0 %v22_v11 }
  0x18   :  { %174 = vmatprep.subr.mxu0 %v21_v12 }
  0x19   :  { %175 = vmatpush3.msra.mxu0 %v21_v12 }
  0x1a   :  { %176 = vmatprep.subr.mxu0 %v20_v13 }
  0x1b   :  { %177 = vmatpush3.msra.mxu0 %v20_v13 }
  0x1c   :  { %178 = vmatprep.subr.mxu0 %v19_v14 }
  0x1d   :  { %179 = vmatpush3.msra.mxu0 %v19_v14 }
  0x1e   :  { %180 = vmatprep.subr.mxu0 %v18_v15 }
  0x1f   :  { %181 = vmatpush3.msra.mxu0 %v18_v15 }
  0x20   :  { %182 = vmatprep.subr.mxu0 %v17_v16 }
  0x21   :  { %183 = vmatpush3.msra.mxu0 %v17_v16 }
  0x22   :  { %185 = vmatmul.mubr.f32.vlgmr.msra.gmra.mxu0 %v16_v17 }
  0xe2   :  { %v186_v19 = vpop.f32.mrf.mxu0 }
  0xe3   :  { %v112_v20 = vadd.f32 %v186_v19, %v133_v18 }
  0xe4   :  { %v106_v21 = vpop.f32.mrf.mxu0 }
  0xe5   :  { %116 = vst [vmem:[#allocation2 + $0x8] sm:$0xff] %v112_v20  ;;  %v107_v22 = vadd.f32 %v133_v18, %v106_v21 }
  0xe7   :  { %115 = vst [vmem:[#allocation2] sm:$0xff] %v107_v22 }
  0xe8   :  { %201 = shalt.err (!%p198_p4)
}
  0xe9   :  { %s213_s0 = smov 128   ;;  %s214_s25 = smov 8  }
  0xea   :  { %128 = dma.vmem_to_hbm [thread:$0]  %s123_s24, 256, %s298_s3, [#allocation3], %s213_s0, %s213_s0, %s214_s25  }
  0xeb   :  { %210 = dma.done.wait [#allocation3], 256  }
  0xec   :  { %211 = vsyncadd [#allocation3], 4294967040 }
  0xed   :  { %132 = vsyncpa [#allocation3], 1 }

</bundles_post_ra>
